<compile_context>
chip_gen: v7x
topology: tpu7x:2x2x1
jax: 0.10.0
libtpu: 0.0.40
codegen_flags: <defaults>
</compile_context>

<pallas_src>
import random
from functools import partial

import jax
import jax.numpy as jnp
from jax import lax
from jax.experimental import pallas as pl
from jax.experimental.pallas import tpu as pltpu


def _jitter_kernel(off_ref, x_ref, o_ref, scr_ref, *, h):
    """Process one (1, cblk, H, W) block: W shift via dynamic lane rotate,
    H shift via doubled-scratch dynamic-window read."""
    off_h = off_ref[0]          # already normalized to [0, H)
    off_w = off_ref[1]          # already normalized to [0, W)
    start_h = h - off_h         # in (0, H]; window [start_h, start_h + H) of 2H rows

    cblk = x_ref.shape[1]

    def body(c, carry):
        img = x_ref[0, c]                             # (H, W) VMEM load
        img = pltpu.roll(img, off_w, axis=1)          # W shift: dynamic lane rotate (XLU)
        # H shift: out[i] = img[(i - off_h) % H] == doubled[start_h + i]
        scr_ref[:h, :] = img
        scr_ref[h:, :] = img
        o_ref[0, c] = scr_ref[pl.ds(start_h, h), :]   # dynamic sublane-window read
        return carry

    lax.fori_loop(0, cblk, body, 0)


def _pick_cblk(c, h, w, itemsize, target_bytes=4 * 1024 * 1024):
    """Largest divisor of C whose (cblk, H, W) block is <= ~4 MiB."""
    per_ch = max(1, h * w * itemsize)
    cap = int(max(1, min(c, target_bytes // per_ch)))
    for cblk in range(cap, 0, -1):
        if c % cblk == 0:
            return cblk
    return 1


@jax.jit
def _roll_pallas(x, offsets):
    b, c, h, w = x.shape
    cblk = _pick_cblk(c, h, w, x.dtype.itemsize)
    # Normalize shifts to [0, H) / [0, W) on-device (stays dynamic, no retrace).
    norm = jnp.remainder(offsets.astype(jnp.int32),
                         jnp.array([h, w], dtype=jnp.int32))
    kernel = partial(_jitter_kernel, h=h)
    return pl.pallas_call(
        kernel,
        out_shape=jax.ShapeDtypeStruct(x.shape, x.dtype),
        grid_spec=pltpu.PrefetchScalarGridSpec(
            num_scalar_prefetch=1,
            grid=(b, c // cblk),
            in_specs=[pl.BlockSpec((1, cblk, h, w),
                                   lambda bi, ci, off: (bi, ci, 0, 0))],
            out_specs=pl.BlockSpec((1, cblk, h, w),
                                   lambda bi, ci, off: (bi, ci, 0, 0)),
            scratch_shapes=[pltpu.VMEM((2 * h, w), x.dtype)],
        ),
        compiler_params=pltpu.CompilerParams(
            dimension_semantics=("parallel", "parallel"),
            vmem_limit_bytes=32 * 1024 * 1024,
        ),
        cost_estimate=pl.CostEstimate(
            flops=0,
            transcendentals=0,
            bytes_accessed=int(2 * x.size * x.dtype.itemsize),
        ),
    )(norm, x)


@jax.jit
def _roll_xla(x, offsets):
    # Fallback: XLA native roll with dynamic shifts (single compile per shape).
    return jnp.roll(x, shift=(offsets[0], offsets[1]), axis=(2, 3))


def jitter_roll(x, off1, off2):
    """torch.roll(x, shifts=(off1, off2), dims=(2, 3)) with runtime offsets."""
    offsets = jnp.asarray([off1, off2], dtype=jnp.int32)
    _, _, h, w = x.shape
    if h % 8 == 0 and w % 128 == 0 and x.dtype.itemsize == 4:
        return _roll_pallas(x, offsets)
    # TODO(synk): lane-sparse (W % 128 != 0), sublane-unaligned, or sub-32-bit
    # inputs use XLA's native roll; a packed-bf16 (bitcast-to-u32) Pallas path
    # could cover 16-bit dtypes later.
    return _roll_xla(x, offsets)


class Jitter:
    """Pallas port of stable-diffusion-guided helpers.Jitter."""

    def __init__(self, lim: int = 32, seed: int = 0):
        self.lim = lim
        # Host-side Python RNG, exactly where the randomness lives in the
        # reference module (random.randint on the host, not a tensor op).
        self._rng = random.Random(seed)

    def __call__(self, x):
        off1 = self._rng.randint(-self.lim, self.lim)
        off2 = self._rng.randint(-self.lim, self.lim)
        return jitter_roll(x, off1, off2)


if __name__ == "__main__":
    # Demo input at the module's natural small shape (takes the XLA-roll fast
    # path: W = 16 < 128 lanes).
    x_small = jax.random.normal(jax.random.PRNGKey(0), (2, 4, 16, 16), jnp.float32)

    # Small but lane-aligned input that exercises the Pallas kernel path
    # (H % 8 == 0, W % 128 == 0).
    x_aligned = jax.random.normal(jax.random.PRNGKey(1), (2, 8, 32, 128), jnp.float32)

    # The same compiled Pallas kernel serves all offset pairs (offsets are
    # runtime scalars, no retrace).  Verify against jnp.roll.
    for off1, off2 in [(5, -3), (0, 0), (-32, 32), (17, 100), (33, -129)]:
        out = jax.block_until_ready(jitter_roll(x_aligned, off1, off2))
        ref = jnp.roll(x_aligned, shift=(off1, off2), axis=(2, 3))
        assert out.shape == x_aligned.shape and out.dtype == x_aligned.dtype
        assert jnp.array_equal(out, ref), f"Pallas roll mismatch at {(off1, off2)}"

    # Fallback path sanity check at the demo shape.
    out_fb = jax.block_until_ready(jitter_roll(x_small, 5, -7))
    ref_fb = jnp.roll(x_small, shift=(5, -7), axis=(2, 3))
    assert jnp.array_equal(out_fb, ref_fb)

    # Exercise the module exactly as the PyTorch reference is used.
    mod = Jitter(lim=32, seed=0)
    out_small = jax.block_until_ready(mod(x_small))
    assert out_small.shape == x_small.shape and out_small.dtype == x_small.dtype

    print("KERNEL_OK")
</pallas_src>

<mosaic_0001>
module attributes {stable_mosaic.version = 11 : i64} {
  func.func @_jitter_kernel(%arg0: i32, %arg1: i32, %arg2: memref<2xi32, #tpu.memory_space<smem>>, %arg3: memref<1x8x32x128xf32, #tpu.memory_space<vmem>>, %arg4: memref<1x8x32x128xf32, #tpu.memory_space<vmem>>, %arg5: memref<64x128xf32, #tpu.memory_space<vmem>>) attributes {dimension_semantics = [#tpu.dimension_semantics<parallel>, #tpu.dimension_semantics<parallel>], iteration_bounds = array<i64: 2, 1>, scalar_prefetch = 1 : i64, scratch_operands = 1 : i64, tpu.core_type = #tpu.core_type<tc>, window_params = [{transform_indices = @transform_0, window_bounds = array<i64: 1, 8, 32, 128>}, {transform_indices = @transform_1, window_bounds = array<i64: 1, 8, 32, 128>}]} {
    %c0 = arith.constant 0 : index
    %0 = memref.load %arg2[%c0] : memref<2xi32, #tpu.memory_space<smem>>
    %c1 = arith.constant 1 : index
    %1 = memref.load %arg2[%c1] : memref<2xi32, #tpu.memory_space<smem>>
    %c32_i32 = arith.constant 32 : i32
    %2 = arith.subi %c32_i32, %0 : i32
    %c0_i32 = arith.constant 0 : i32
    %c8_i32 = arith.constant 8 : i32
    %3 = arith.addi %c0_i32, %c8_i32 : i32
    %c1_i32 = arith.constant 1 : i32
    scf.for %arg6 = %c0_i32 to %3 step %c1_i32  : i32 {
      %c0_1 = arith.constant 0 : index
      %4 = arith.index_cast %arg6 : i32 to index
      %c0_2 = arith.constant 0 : index
      %c0_3 = arith.constant 0 : index
      %5 = vector.load %arg3[%c0_1, %4, %c0_2, %c0_3] : memref<1x8x32x128xf32, #tpu.memory_space<vmem>>, vector<1x1x32x128xf32>
      %6 = vector.shape_cast %5 : vector<1x1x32x128xf32> to vector<32x128xf32>
      %7 = tpu.dynamic_rotate %6 by %1 dim 1 : vector<32x128xf32>, i32 -> vector<32x128xf32>
      %c0_4 = arith.constant 0 : index
      %c0_5 = arith.constant 0 : index
      %8 = vector.load %arg5[%c0_4, %c0_5] : memref<64x128xf32, #tpu.memory_space<vmem>>, vector<32x128xf32>
      tpu.vector_store %arg5[%c0_4, %c0_5], %7 {strides = array<i32>} : memref<64x128xf32, #tpu.memory_space<vmem>>, vector<32x128xf32>,
      %c32 = arith.constant 32 : index
      %c0_6 = arith.constant 0 : index
      %9 = vector.load %arg5[%c32, %c0_6] : memref<64x128xf32, #tpu.memory_space<vmem>>, vector<32x128xf32>
      tpu.vector_store %arg5[%c32, %c0_6], %7 {strides = array<i32>} : memref<64x128xf32, #tpu.memory_space<vmem>>, vector<32x128xf32>,
      %10 = arith.index_cast %2 : i32 to index
      %c0_7 = arith.constant 0 : index
      %11 = vector.load %arg5[%10, %c0_7] : memref<64x128xf32, #tpu.memory_space<vmem>>, vector<32x128xf32>
      %c0_8 = arith.constant 0 : index
      %12 = arith.index_cast %arg6 : i32 to index
      %c0_9 = arith.constant 0 : index
      %c0_10 = arith.constant 0 : index
      %13 = vector.load %arg4[%c0_8, %12, %c0_9, %c0_10] : memref<1x8x32x128xf32, #tpu.memory_space<vmem>>, vector<1x1x32x128xf32>
      %14 = vector.shape_cast %13 : vector<1x1x32x128xf32> to vector<32x128xf32>
      %15 = vector.shape_cast %11 : vector<32x128xf32> to vector<1x1x32x128xf32>
      tpu.vector_store %arg4[%c0_8, %12, %c0_9, %c0_10], %15 {strides = array<i32>} : memref<1x8x32x128xf32, #tpu.memory_space<vmem>>, vector<1x1x32x128xf32>,
    }
    %c8_i32_0 = arith.constant 8 : i32
    return
  }
  func.func @transform_0(%arg0: i32, %arg1: i32, %arg2: memref<2xi32, #tpu.memory_space<smem>>) -> (i32, i32, i32, i32) {
    %c0_i32 = arith.constant 0 : i32
    %c0_i32_0 = arith.constant 0 : i32
    %c0_i32_1 = arith.constant 0 : i32
    return %arg0, %arg1, %c0_i32, %c0_i32_0 : i32, i32, i32, i32
  }
  func.func @transform_1(%arg0: i32, %arg1: i32, %arg2: memref<2xi32, #tpu.memory_space<smem>>) -> (i32, i32, i32, i32) {
    %c0_i32 = arith.constant 0 : i32
    %c0_i32_0 = arith.constant 0 : i32
    %c0_i32_1 = arith.constant 0 : i32
    return %arg0, %arg1, %c0_i32, %c0_i32_0 : i32, i32, i32, i32
  }
}

</mosaic_0001>

<bundles_post_ra>
// kernel: _roll_pallas.1
= control target key start
LH: loop header
LB: loop body
LE: loop exit
PB: predicated region body
PF: predicated region fallthrough
CT: control target
= control target key end

     0   :  { %s774_s0 = inlined_call_operand.vmem [shape: s32[2], index: 0, kind: input, shape index: {}]   ;;  %s775_s1 = inlined_call_operand.hbm [shape: f32[2,8,32,128], index: 1, kind: input, shape index: {}]   ;;  %s776_s2 = inlined_call_operand.hbm [shape: f32[2,8,32,128], index: 2, kind: output, shape index: {}]  }
   0x1   :  { %s7_s11 = sshll.u32 %s774_s0, 4  ;;  %s8_s11 = int_to_ptr.vmem [resolvable:$true] %s7_s11 }
   0x2   :  { %s414_s12 = scalar_lea.vmem %s8_s11, 16  ;;  %p419_p1 = scmp.lt.s32.totalorder %s8_s11, %s8_s11 }
   0x3   :  { %p415_p0 = scmp.ne.s32.totalorder %s8_s11, %s414_s12  ;;  %p420_p2 = scmp.lt.s32.totalorder %s414_s12, %s414_s12 }
   0x5   :  { %p421_p3 = por %p420_p2, %p419_p1 }
   0x7   :  { %p422_p4 = pnand %p421_p3, %p415_p0 }
   0x9   :  { %425 = shalt.err (!%p422_p4)  }
   0xa   :  { %s550_s13 = smov [#allocation4]  }
   0xb   :  { %10 = dma.vmem_to_smem %s8_s11, 16, %s550_s13, [#allocation3] }
   0xc   :  { %512 = dma.done.wait [#allocation3], 16 }
   0xd   :  { %513 = vsyncadd [#allocation3], 4294967280 }
   0xe   :  { %12 = sfence }
   0xf   :  { %13 = vsyncpa [#allocation6], 0 }
  0x10   :  { %15 = vsyncpa [#allocation6 + $0x1], 0 }
  0x11   :  { %16 = vsyncpa [#allocation7], 0 }
  0x12   :  { %18 = vsyncpa [#allocation7 + $0x1], 0  ;;  %s575_s14 = smov 0   ;;  %s577_s0 = smov 0  }
  0x13   :  { %s579_s15 = smov 0   ;;  %s581_s16 = smov 0  }
  0x14   :  { %s583_s17 = smov 0   ;;  %s585_s18 = smov 0  }
  0x15 LB: > { %s320_s19 = sadd.s32 4294967295, %s544_s18   ;;  %s321_s20 = sadd.s32 4294967294, %s544_s18   ;;  %s544_s18 = sphi %s585_s18, %s24_s18   ;;  %s540_s17 = sphi %s583_s17, %s791_s17   ;;  %s536_s16 = sphi %s581_s16, %s790_s16   ;;  %s532_s15 = sphi %s579_s15, %s789_s15   ;;  %s528_s0 = sphi %s577_s0, %s788_s0   ;;  %s524_s14 = sphi %s575_s14, %s787_s14  }
  0x16   : > { %s36_s21 = sadd.s32 1, %s540_s17  ;;  %s45_s22 = sadd.s32 1, %s532_s15 }
  0x17   : > { %p38_p5 = scmp.ge.s32.totalorder %s36_s21, 2  ;;  %p52_p6 = scmp.ne.s32.totalorder %s532_s15, %s528_s0 }
  0x18   : > { %p53_p7 = scmp.eq.s32.totalorder %s544_s18, 0  ;;  %p58_p8 = scmp.ne.s32.totalorder %s528_s0, %s524_s14 }
  0x19   : > { %s793_s21 = smov (%p38_p5, %s36_s21), 0  ;;  %p59_p10 = scmp.eq.s32.totalorder %s320_s19, 0 }
  0x1a   : > { %p616_p9 = por %p53_p7, %p52_p6  ;;  %s40_s24 = ssub.s32 %s540_s17, %s793_s21 }
  0x1b   : > { %p84_p11 = scmp.eq.s32.totalorder %s320_s19, 1  ;;  %p43_p12 = scmp.eq.s32.totalorder %s40_s24, 0 }
  0x1c   : > { %p622_p13 = por %p59_p10, %p58_p8  ;;  %p90_p1 = scmp.eq.s32.totalorder %s321_s20, 1 }
  0x1d   : > { %p626_p0 = por %p84_p11, %p52_p6  ;;  %p351_p4 = scmp.lt.s32.totalorder %s544_s18, 2 }
  0x1e   : > { %s631_s27 = scalar_select %p43_p12, %s532_s15, %s45_s22  }
  0x1f   : > { %s780_s26 = scalar_select %p626_p0, 1, 0 }
  0x20   : > { %p633_p2 = por %p90_p1, %p58_p8  ;;  %s110_s29 = sand.u32 1, %s532_s15  }
  0x21   : > { %s324_s30 = sshll.u32 %s110_s29, 8  ;;  %s337_s3 = sshll.u32 %s540_s17, 12 }
  0x22   : > { %s781_s28 = scalar_select %p633_p2, 1, 0 }
  0x23   : > { %s644_s6 = scalar_lea.hbm %s775_s1, %s337_s3  ;;  %s114_s7 = scalar_lea.vmem [#allocation5], %s324_s30 }
  0x24   : > { %s124_s8 = sshll.u32 %s114_s7, 4  ;;  %p650_p5 = pnand %p351_p4, %p616_p9  ;;  %s646_s8 = int_to_ptr.vmem [resolvable:$true] %s124_s8 }
  0x25   : > { %s655_s10 = scalar_lea.sflag [#allocation6], %s110_s29  ;;  %s426_s11 = scalar_lea.hbm %s644_s6, 4096 }
  0x26   : > { %p427_p7 = scmp.ne.s32.totalorder %s644_s6, %s426_s11  ;;  %p428_p8 = pneg %p650_p5 }
  0x27   : > { %s431_s19 = scalar_lea.hbm %s775_s1, 8192  ;;  %p432_p9 = scmp.lt.u32.totalorder %s644_s6, %s775_s1 }
  0x28   : > { %p429_p10 = pnand %p428_p8, %p427_p7  ;;  %p433_p12 = scmp.lt.u32.totalorder %s431_s19, %s426_s11 }
  0x29   : > { %p435_p4 = scmp.lt.u32.totalorder %s426_s11, %s644_s6 }
  0x2a   : > { %p430_p11 = pneg %p429_p10  ;;  %p434_p1 = por %p433_p12, %p432_p9 }
  0x2c   : > { %p436_p3 = por %p435_p4, %p434_p1 }
  0x2e   : > { %p437_p6 = pnand %p436_p3, %p430_p11 }
  0x30   : > { %440 = shalt.err (!%p437_p6)
}
  0x31   : > { %s441_s23 = scalar_lea.vmem %s646_s8, 4096  ;;  %s551_s24 = smov [#allocation5]  }
  0x32   : > { %p442_p7 = scmp.ne.s32.totalorder %s646_s8, %s441_s23  ;;  %s446_s29 = sshll.u32 %s551_s24, 4  ;;  %s447_s29 = int_to_ptr.vmem [resolvable:$false] %s446_s29 }
  0x33   : > { %s448_s30 = scalar_lea.vmem %s447_s29, 8192  ;;  %p449_p0 = scmp.lt.s32.totalorder %s646_s8, %s447_s29 }
  0x34   : > { %p444_p10 = pnand %p442_p7, %p428_p8  ;;  %p450_p9 = scmp.lt.s32.totalorder %s448_s30, %s441_s23 }
  0x36   : > { %p445_p2 = pneg %p444_p10  ;;  %p451_p12 = por %p450_p9, %p449_p0 }
  0x38   : > { %p452_p1 = pnand %p451_p12, %p445_p2 }
  0x3a   : > { %455 = shalt.err (!%p452_p1)
}
  0x3b   : > { %s552_s3 = smov 128   ;;  %s553_s4 = smov 8  }
  0x3c   : > { %346 = dma.hbm_to_vmem [thread:$0]  (!%p650_p5), %s644_s6, 4096, %s646_s8, %s655_s10, %s552_s3, %s552_s3, %s553_s4  }
  0x3d   : > { %p132_p3 = scmp.lt.s32.totalorder %s544_s18, 3  ;;  %p783_p6 = scmp.ge.s32.totalorder %s544_s18, 1 }
  0x3f   : > { %p133_p8 = pnand %p783_p6, %p132_p3 }
  0x40   : > { %s687_s5 = sand.u32 (!%p133_p8), 1, %s528_s0  }
  0x41   : > { %136 = sbr.rel (%p133_p8) target bundleno = 227 (0xe3), region = 24  ;;  %s328_s7 = sshll.u32 (!%p133_p8), %s687_s5, 8 }
  0x42   : > { %s139_s11 = scalar_lea.sflag (!%p133_p8), [#allocation6], %s687_s5  ;;  %s691_s12 = scalar_lea.vmem (!%p133_p8), [#allocation5], %s328_s7 }
  0x48   : > { %515 = dma.done.wait (%p622_p13), %s139_s11, 4096  }
  0x49   : > { %517 = vsyncadd (%p622_p13), %s139_s11, 4294963200  ;;  %s697_s6 = sld [smem:[#allocation4]]  ;;  %s699_s8 = sld [smem:[#allocation4 + $0x1]] }
  0x4a   : > { %s702_s10 = scalar_lea.vmem [#allocation8], %s328_s7  ;;  %s704_s13 = smov 0  }
  0x4f   : > { %s165_s9 = ssub.s32 32, %s697_s6 }
  0x50 LB: >> { %s331_s25 = sshll.u32 %s548_s13, 5  ;;  %s178_s19 = sand.u32 127, %s699_s8   ;;  %s548_s13 = sphi %s704_s13, %s171_s13  }
  0x51   : >> { %s173_s20 = scalar_lea.vmem %s691_s12, %s331_s25 [#allocation5]  ;;  %s201_s22 = scalar_lea.vmem %s702_s10, %s331_s25 [#allocation8] }
  0x52   : >> { %v176_v0 = vld [vmem:[%s173_s20 + $0x10] sm:$0xff]  ;;  %v174_v1 = vld [vmem:[%s173_s20] sm:$0xff]  ;;  %v177_v2 = vld [vmem:[%s173_s20 + $0x18] sm:$0xff]  ;;  %s196_s23 = scalar_lea.vmem [#allocation2], %s165_s9  ;;  %s171_s13 = sadd.s32 1, %s548_s13  }
  0x53   : >> { %184 = vrot.lane.b32.xlu1 %v176_v0, %s178_s19  ;;  %180 = vrot.lane.b32.xlu0 %v174_v1, %s178_s19  ;;  %v175_v3 = vld [vmem:[%s173_s20 + $0x8] sm:$0xff]  ;;  %p168_p13 = scmp.ge.s32.totalorder %s171_s13, 8  }
  0x54   : > { %s338_s24 = sshll.u32 (%p168_p13), %s536_s16, 12  ;;  %s223_s4 = sshll.u32 (%p168_p13), %s702_s10, 4  ;;  %s725_s4 = int_to_ptr.vmem [resolvable:$true] %s223_s4 }
  0x55   : > { %s722_s3 = scalar_lea.hbm (%p168_p13), %s776_s2, %s338_s24  ;;  %s207_s7 = scalar_lea.sflag (%p168_p13), [#allocation7], %s687_s5 }
  0x56   : > { %s456_s11 = scalar_lea.vmem (%p168_p13), %s725_s4, 4096  ;;  %p784_p2 = scmp.ne.s32.totalorder (%p168_p13), %s780_s26, 0 }
  0x57   : >> { %186 = vrot.lane.b32.xlu1 %v177_v2, %s178_s19  ;;  %182 = vrot.lane.b32.xlu0 %v175_v3, %s178_s19  ;;  %p457_p0 = scmp.ne.s32.totalorder (%p168_p13), %s725_s4, %s456_s11  ;;  %s554_s12 = smov (%p168_p13), [#allocation8]  }
  0x58   : > { %s460_s6 = sshll.u32 (%p168_p13), %s554_s12, 4  ;;  %s461_s6 = int_to_ptr.vmem [resolvable:$false] %s460_s6 }
  0x59   : > { %p458_p5 = pnand (%p168_p13), %p457_p0, %p784_p2  ;;  %s462_s16 = scalar_lea.vmem (%p168_p13), %s461_s6, 8192 }
  0x5a   : > { %p463_p4 = scmp.lt.s32.totalorder (%p168_p13), %s725_s4, %s461_s6  ;;  %p464_p7 = scmp.lt.s32.totalorder (%p168_p13), %s462_s16, %s456_s11 }
  0x5b   : > { %p459_p11 = pneg (%p168_p13), %p458_p5 }
  0x5c   : > { %p465_p10 = por (%p168_p13), %p464_p7, %p463_p4 }
  0x5e   : > { %p466_p9 = pnand (%p168_p13), %p465_p10, %p459_p11 }
  0xc5   : >> { %v185_v4 = vpop.permute.xlu1 %184  ;;  %v181_v5 = vpop.permute.xlu0 %180 }
  0xc6   : >> { %190 = vst [vmem:[#allocation2 + $0x10] sm:$0xff] %v185_v4  ;;  %194 = vst [vmem:[#allocation2 + $0x30] sm:$0xff] %v185_v4 }
  0xc7   : >> { %188 = vst [vmem:[#allocation2] sm:$0xff] %v181_v5  ;;  %192 = vst [vmem:[#allocation2 + $0x20] sm:$0xff] %v181_v5 }
  0xc9   : >> { %v187_v6 = vpop.permute.xlu1 %186  ;;  %v183_v7 = vpop.permute.xlu0 %182 }
  0xca   : >> { %191 = vst [vmem:[#allocation2 + $0x18] sm:$0xff] %v187_v6  ;;  %195 = vst [vmem:[#allocation2 + $0x38] sm:$0xff] %v187_v6 }
  0xcb   : >> { %189 = vst [vmem:[#allocation2 + $0x8] sm:$0xff] %v183_v7  ;;  %193 = vst [vmem:[#allocation2 + $0x28] sm:$0xff] %v183_v7 }
  0xce   : > { %170 = sbr.rel (!%p168_p13) target bundleno = 80 (0x50), region = 79 }
  0xd2   : >> { %v197_v8 = vld [vmem:[%s196_s23] sm:$0xff]  ;;  %v198_v9 = vld [vmem:[%s196_s23 + $0x8] sm:$0xff]  ;;  %v199_v10 = vld [vmem:[%s196_s23 + $0x10] sm:$0xff] }
  0xd3   : >> { %v200_v11 = vld [vmem:[%s196_s23 + $0x18] sm:$0xff]  ;;  %202 = vst [vmem:[%s201_s22] sm:$0xff] %v197_v8  ;;  %203 = vst [vmem:[%s201_s22 + $0x8] sm:$0xff] %v198_v9 }
  0xd4   : >> { %204 = vst [vmem:[%s201_s22 + $0x10] sm:$0xff] %v199_v10  ;;  %205 = vst [vmem:[%s201_s22 + $0x18] sm:$0xff] %v200_v11 }
  0xd5   : > { %469 = shalt.err (!%p466_p9)
}
  0xd6   : > { %s470_s8 = scalar_lea.hbm %s722_s3, 4096  ;;  %s474_s13 = scalar_lea.hbm %s776_s2, 8192 }
  0xd7   : > { %p471_p12 = scmp.ne.s32.totalorder %s722_s3, %s470_s8  ;;  %p475_p6 = scmp.lt.u32.totalorder %s722_s3, %s776_s2 }
  0xd8   : > { %p476_p8 = scmp.lt.u32.totalorder %s474_s13, %s470_s8  ;;  %p478_p0 = scmp.lt.u32.totalorder %s470_s8, %s722_s3 }
  0xd9   : > { %p472_p1 = pnand %p471_p12, %p784_p2 }
  0xda   : > { %p477_p13 = por %p476_p8, %p475_p6 }
  0xdb   : > { %p473_p3 = pneg %p472_p1 }
  0xdc   : > { %p479_p5 = por %p478_p0, %p477_p13 }
  0xde   : > { %p480_p11 = pnand %p479_p5, %p473_p3 }
  0xe0   : > { %483 = shalt.err (!%p480_p11)
}
  0xe1   : > { %s555_s20 = smov 128   ;;  %s556_s22 = smov 8  }
  0xe2   : > { %341 = dma.vmem_to_hbm [thread:$0]  (%p784_p2), %s725_s4, 4096, %s722_s3, %s207_s7, %s555_s20, %s555_s20, %s556_s22  }
  0xe3 PF: > { %s238_s23 = sand.u32 1, %s524_s14   ;;  %p785_p4 = scmp.ne.s32.totalorder %s781_s28, 0 }
  0xe4   : > { %p786_p7 = scmp.ge.s32.totalorder %s544_s18, 2  ;;  %s239_s24 = scalar_lea.sflag [#allocation7], %s238_s23 }
  0xe6   : > { %p348_p10 = pnand %p786_p7, %p785_p4 }
  0xe8   : > { %519 = dma.done.wait (!%p348_p10), %s239_s24, 4096  }
  0xe9   : > { %521 = vsyncadd (!%p348_p10), %s239_s24, 4294963200  ;;  %s24_s18 = sadd.s32 1, %s544_s18   ;;  %s787_s14 = smov %s528_s0 }
  0xea   : > { %p21_p9 = scmp.ge.s32.totalorder %s24_s18, 4   ;;  %s788_s0 = smov %s532_s15 }
  0xeb   : > { %s789_s15 = smov %s631_s27  ;;  %s790_s16 = smov %s540_s17 }
  0xec   : > { %s791_s17 = smov %s793_s21  ;;  %23 = sbr.rel (!%p21_p9) target bundleno = 21 (0x15), region = 90 }
  0xf3   :  { %244 = vsyncpa [#allocation6], 1 }
  0xf4   :  { %246 = vsyncpa [#allocation6 + $0x1], 1 }
  0xf5   :  { %247 = vsyncpa [#allocation7], 1 }
  0xf6   :  { %249 = vsyncpa [#allocation7 + $0x1], 1 }

</bundles_post_ra>
